<compile_context>
chip_gen: v7x
topology: tpu7x:2x2x1
jax: 0.10.0
libtpu: 0.0.40
codegen_flags: <defaults>
</compile_context>

<pallas_src>
import jax
import jax.numpy as jnp
from jax.experimental import pallas as pl
from jax.experimental.pallas import tpu as pltpu


def _round_up(x, m):
    return ((x + m - 1) // m) * m


def make_3tuple(x):
    if isinstance(x, tuple):
        assert len(x) == 3
        return x
    assert isinstance(x, int)
    return (x, x, x)


# Target for the double-buffered per-step working set; fits comfortably in
# v7x's 64 MiB physical VMEM and under v5e/v6e physical 128 MiB.
_VMEM_BUDGET_BYTES = 40 * 1024 * 1024


def _patch_proj_kernel(x_ref, w_ref, b_ref, o_ref):
    """One (tm, K) x (K, tn) MXU matmul; bias + downcast fused in epilogue."""
    acc = jnp.dot(x_ref[...], w_ref[...], preferred_element_type=jnp.float32)
    o_ref[...] = (acc + b_ref[...]).astype(o_ref.dtype)


def _select_tiles(M, K, Ep, out_bytes):
    """Pick (tm, Mp, tn): pad-free sublane-aligned M tiles, lane-dense E tiles."""
    # tm: a multiple-of-8 divisor of M (no jnp.pad pass), capped at 512,
    # preferring >= 2 tiles so v7x megacore has work for both TensorCores.
    if M % 8 == 0:
        divs = [d for d in range(8, min(M, 512) + 1, 8) if M % d == 0]
        two = [d for d in divs if M // d >= 2]
        pool = two or divs
        tm = max(pool) if pool else M
        Mp = M
    else:
        tm = min(512, _round_up(M, 8))
        Mp = _round_up(M, tm)

    def footprint(tm_, tn_):
        # double-buffered x, w, bias and out blocks
        return 2 * (tm_ * K * 2 + K * tn_ * 2 + tn_ * 4 + tm_ * tn_ * out_bytes)

    # tn: whole Ep if it fits the VMEM budget (weight DMA'd exactly once and
    # held resident); otherwise the largest 128-multiple divisor of Ep that fits.
    q = Ep // 128
    tn_candidates = sorted({128 * d for d in range(1, q + 1) if q % d == 0},
                           reverse=True)
    tn = tn_candidates[-1]  # 128 fallback
    for cand in tn_candidates:
        if footprint(tm, cand) <= _VMEM_BUDGET_BYTES:
            tn = cand
            break
    # TODO(synk): for extremely large K the x/w blocks could still exceed the
    # budget; a K-reduction grid axis would be needed in that regime.
    return tm, Mp, tn


def _patch_proj_pallas(patches_bf16, w_ke_bf16, bias_pad_f32, *, out_dtype):
    """patches: (M, K) bf16, w: (K, Ep) bf16, bias: (1, Ep) f32 -> (M, Ep)."""
    M, K = patches_bf16.shape
    K2, Ep = w_ke_bf16.shape
    assert K == K2, (K, K2)
    assert Ep % 128 == 0, Ep

    out_bytes = jnp.dtype(out_dtype).itemsize
    tm, Mp, tn = _select_tiles(M, K, Ep, out_bytes)

    x = patches_bf16
    if Mp != M:
        x = jnp.pad(x, ((0, Mp - M), (0, 0)))

    n_m = Mp // tm
    n_e = Ep // tn

    vmem_needed = 2 * (tm * K * 2 + K * tn * 2 + tn * 4 + tm * tn * out_bytes)
    # v5e's scoped-VMEM default is 16 MiB; raise it so the resident-weight
    # tiles compile there.  Stays well under v7x's 64 MiB physical VMEM.
    vmem_limit = max(vmem_needed + (4 << 20), 32 << 20)

    out = pl.pallas_call(
        _patch_proj_kernel,
        out_shape=jax.ShapeDtypeStruct((Mp, Ep), out_dtype),
        grid_spec=pltpu.PrefetchScalarGridSpec(
            num_scalar_prefetch=0,
            grid=(n_m, n_e),
            in_specs=[
                # x block index is constant across the (inner) E axis ->
                # Pallas skips the re-DMA; X streamed exactly once.
                pl.BlockSpec((tm, K), lambda i, j: (i, 0)),
                # when n_e == 1 the weight block index is constant across the
                # whole grid -> fetched once and held resident in VMEM.
                pl.BlockSpec((K, tn), lambda i, j: (0, j)),
                pl.BlockSpec((1, tn), lambda i, j: (0, j)),
            ],
            out_specs=pl.BlockSpec((tm, tn), lambda i, j: (i, j)),
        ),
        compiler_params=pltpu.CompilerParams(
            dimension_semantics=("parallel", "parallel"),
            vmem_limit_bytes=vmem_limit,
        ),
        cost_estimate=pl.CostEstimate(
            flops=2 * Mp * K * Ep,
            transcendentals=0,
            bytes_accessed=(Mp * K * 2
                            + K * Ep * 2 * (n_m if n_e > 1 else 1)
                            + Mp * Ep * out_bytes),
        ),
    )(x, w_ke_bf16, bias_pad_f32)

    return out


class PatchEmbed3dPallas:
    """JAX/Pallas re-implementation of dinov2 PatchEmbed3d (norm=Identity)."""

    def __init__(self, img_size=96, patch_size=16, in_chans=1, embed_dim=768,
                 norm_layer=None, flatten_embedding=True, key=None,
                 dtype=jnp.float32):
        assert norm_layer is None  # reference default -> nn.Identity (no-op)
        self.img_size = make_3tuple(img_size)
        self.patch_size = make_3tuple(patch_size)
        self.patches_resolution = tuple(
            s // p for s, p in zip(self.img_size, self.patch_size)
        )
        self.num_patches = (
            self.patches_resolution[0]
            * self.patches_resolution[1]
            * self.patches_resolution[2]
        )
        self.in_chans = in_chans
        self.embed_dim = embed_dim
        self.flatten_embedding = flatten_embedding

        if key is None:
            key = jax.random.PRNGKey(0)
        wkey, bkey = jax.random.split(key)
        pH, pW, pD = self.patch_size
        fan_in = in_chans * pH * pW * pD
        bound = 1.0 / float(jnp.sqrt(fan_in))
        # Conv3d weight layout: (E, C, pH, pW, pD); bias: (E,)
        self.weight = jax.random.uniform(
            wkey, (embed_dim, in_chans, pH, pW, pD),
            minval=-bound, maxval=bound, dtype=dtype,
        )
        self.bias = jax.random.uniform(
            bkey, (embed_dim,), minval=-bound, maxval=bound, dtype=dtype
        )

        # Precompute the (K, Ep) projection matrix and padded bias ONCE.
        # E is padded to >= 256 and a multiple of 128: lane-dense unmasked
        # stores and a full 256-wide MXU pass on v6e/v7x.
        K = in_chans * pH * pW * pD
        Ep = max(_round_up(embed_dim, 128), 256)
        self._Ep = Ep
        w_ke = self.weight.reshape(embed_dim, K).T.astype(jnp.float32)
        self.w_ke = w_ke                                   # (K, E) f32 reference
        w_bf16 = w_ke.astype(jnp.bfloat16)
        if Ep != embed_dim:
            w_bf16 = jnp.pad(w_bf16, ((0, 0), (0, Ep - embed_dim)))
        self.w_ke_bf16 = w_bf16                            # (K, Ep) bf16
        b = self.bias.astype(jnp.float32).reshape(1, embed_dim)
        if Ep != embed_dim:
            b = jnp.pad(b, ((0, 0), (0, Ep - embed_dim)))
        self.bias_pad = b                                  # (1, Ep) f32

    def __call__(self, x):
        # x: (B, C, H, W, D)
        B, C, H, W, D = x.shape
        pH, pW, pD = self.patch_size
        assert C == self.in_chans
        assert H % pH == 0 and W % pW == 0 and D % pD == 0
        Gh, Gw, Gd = H // pH, W // pW, D // pD
        E = self.embed_dim
        K = C * pH * pW * pD
        M = B * Gh * Gw * Gd

        # im2col: extract non-overlapping patches -> (M, K).
        # Cast to bf16 FIRST so the transpose moves half the bytes.
        # Row order (b, gh, gw, gd) matches PyTorch flatten(2).transpose(1,2);
        # column order (c, i, j, k) matches the Conv3d weight layout.
        # TODO(synk): fuse this transpose into the kernel via strided DMA gathers.
        xb = x.astype(jnp.bfloat16)
        xp = xb.reshape(B, C, Gh, pH, Gw, pW, Gd, pD)
        xp = jnp.transpose(xp, (0, 2, 4, 6, 1, 3, 5, 7))
        patches = xp.reshape(M, K)

        out = _patch_proj_pallas(
            patches, self.w_ke_bf16, self.bias_pad, out_dtype=x.dtype
        )  # (Mp, Ep)

        out = out[:M, :E]                  # strip E (and any M) padding
        out = out.reshape(B, Gh * Gw * Gd, E)   # (B, N, E)
        if not self.flatten_embedding:
            out = out.reshape(-1, Gh, Gw, Gd, E)
        return out


def _reference_forward(module, x):
    """Pure-jnp reference of the same math (bf16 operands, f32 accumulate)."""
    B, C, H, W, D = x.shape
    pH, pW, pD = module.patch_size
    Gh, Gw, Gd = H // pH, W // pW, D // pD
    E = module.embed_dim
    xp = x.reshape(B, C, Gh, pH, Gw, pW, Gd, pD)
    xp = jnp.transpose(xp, (0, 2, 4, 6, 1, 3, 5, 7)).reshape(
        B * Gh * Gw * Gd, C * pH * pW * pD
    )
    xp = xp.astype(jnp.bfloat16).astype(jnp.float32)
    w = module.w_ke.astype(jnp.bfloat16).astype(jnp.float32)
    y = xp @ w + module.bias.astype(jnp.float32)
    return y.astype(x.dtype).reshape(B, Gh * Gw * Gd, E)


if __name__ == "__main__":
    key = jax.random.PRNGKey(0)
    pkey, xkey = jax.random.split(key)

    # Small shapes consistent with the module:
    #   B=2, in_chans=2, img=(16,16,16), patch=(8,8,8), embed_dim=32
    #   -> patch grid (2,2,2), N=8, K = 2*8*8*8 = 1024, M = B*N = 16
    B, C = 2, 2
    img_size, patch_size, embed_dim = 16, 8, 32

    module = PatchEmbed3dPallas(
        img_size=img_size,
        patch_size=patch_size,
        in_chans=C,
        embed_dim=embed_dim,
        flatten_embedding=True,
        key=pkey,
    )

    x = jax.random.normal(
        xkey, (B, C, img_size, img_size, img_size), dtype=jnp.float32
    )

    out = module(x)
    out = jax.block_until_ready(out)

    ref = _reference_forward(module, x)
    assert out.shape == (B, module.num_patches, embed_dim), out.shape
    assert out.dtype == x.dtype, out.dtype
    # NOTE: operands are bf16 on the MXU (f32 accumulate), so tolerance is
    # bf16-level vs an f32 PyTorch Conv3d; the bf16 reference matches tightly.
    assert jnp.allclose(out, ref, atol=2e-2, rtol=2e-2), (
        float(jnp.max(jnp.abs(out - ref)))
    )

    print("KERNEL_OK")
</pallas_src>

<mosaic_0001>
module attributes {stable_mosaic.version = 11 : i64} {
  func.func @_patch_proj_kernel(%arg0: i32, %arg1: i32, %arg2: memref<8x1024xbf16, #tpu.memory_space<vmem>>, %arg3: memref<1024x256xbf16, #tpu.memory_space<vmem>>, %arg4: memref<1x256xf32, #tpu.memory_space<vmem>>, %arg5: memref<8x256xf32, #tpu.memory_space<vmem>>) attributes {dimension_semantics = [#tpu.dimension_semantics<parallel>, #tpu.dimension_semantics<parallel>], iteration_bounds = array<i64: 2, 1>, scalar_prefetch = 0 : i64, scratch_operands = 0 : i64, tpu.core_type = #tpu.core_type<tc>, window_params = [{transform_indices = @transform_0, window_bounds = array<i64: 8, 1024>}, {transform_indices = @transform_1, window_bounds = array<i64: 1024, 256>}, {transform_indices = @transform_2, window_bounds = array<i64: 1, 256>}, {transform_indices = @transform_3, window_bounds = array<i64: 8, 256>}]} {
    %c0 = arith.constant 0 : index
    %c0_0 = arith.constant 0 : index
    %0 = vector.load %arg2[%c0, %c0_0] : memref<8x1024xbf16, #tpu.memory_space<vmem>>, vector<8x1024xbf16>
    %c0_1 = arith.constant 0 : index
    %c0_2 = arith.constant 0 : index
    %1 = vector.load %arg3[%c0_1, %c0_2] : memref<1024x256xbf16, #tpu.memory_space<vmem>>, vector<1024x256xbf16>
    %cst = arith.constant dense<0.000000e+00> : vector<8x256xf32>
    %2 = tpu.matmul %0, %1, %cst {dimension_numbers = #tpu.dot_dimension_numbers<[1], [0], [0], [1], [0, 0, 1, 1], [], []>} : vector<8x1024xbf16>, vector<1024x256xbf16>, vector<8x256xf32> -> vector<8x256xf32>
    %c0_3 = arith.constant 0 : index
    %c0_4 = arith.constant 0 : index
    %3 = vector.load %arg4[%c0_3, %c0_4] : memref<1x256xf32, #tpu.memory_space<vmem>>, vector<1x256xf32>
    %4 = vector.broadcast %3 : vector<1x256xf32> to vector<8x256xf32>
    %5 = arith.addf %2, %4 : vector<8x256xf32>
    %c0_5 = arith.constant 0 : index
    %c0_6 = arith.constant 0 : index
    %6 = vector.load %arg5[%c0_5, %c0_6] : memref<8x256xf32, #tpu.memory_space<vmem>>, vector<8x256xf32>
    tpu.vector_store %arg5[%c0_5, %c0_6], %5 {strides = array<i32>} : memref<8x256xf32, #tpu.memory_space<vmem>>, vector<8x256xf32>,
    return
  }
  func.func @transform_0(%arg0: i32, %arg1: i32) -> (i32, i32) {
    %c0_i32 = arith.constant 0 : i32
    %c0_i32_0 = arith.constant 0 : i32
    return %arg0, %c0_i32 : i32, i32
  }
  func.func @transform_1(%arg0: i32, %arg1: i32) -> (i32, i32) {
    %c0_i32 = arith.constant 0 : i32
    %c0_i32_0 = arith.constant 0 : i32
    return %c0_i32, %arg1 : i32, i32
  }
  func.func @transform_2(%arg0: i32, %arg1: i32) -> (i32, i32) {
    %c0_i32 = arith.constant 0 : i32
    %c0_i32_0 = arith.constant 0 : i32
    return %c0_i32, %arg1 : i32, i32
  }
  func.func @transform_3(%arg0: i32, %arg1: i32) -> (i32, i32) {
    %c0_i32 = arith.constant 0 : i32
    return %arg0, %arg1 : i32, i32
  }
}

</mosaic_0001>

<bundles_post_ra>
// kernel: tpu_custom_call.1
= control target key start
LH: loop header
LB: loop body
LE: loop exit
PB: predicated region body
PF: predicated region fallthrough
CT: control target
= control target key end

     0   :  { %8 = vsyncpa [#allocation3], 0  ;;  %s2195_s0 = inlined_call_operand.hbm [shape: bf16[16,1024], index: 0, kind: input, shape index: {}]   ;;  %s2196_s1 = inlined_call_operand.hbm [shape: bf16[1024,256], index: 1, kind: input, shape index: {}]   ;;  %s2197_s2 = inlined_call_operand.vmem [shape: f32[1,256], index: 2, kind: input, shape index: {}]   ;;  %s2198_s3 = inlined_call_operand.hbm [shape: f32[16,256], index: 3, kind: output, shape index: {}]  }
   0x1   :  { %10 = vsyncpa [#allocation3 + $0x1], 0 }
   0x2   :  { %11 = vsyncpa [#allocation6], 0 }
   0x3   :  { %12 = vsyncpa [#allocation4], 0 }
   0x4   :  { %14 = vsyncpa [#allocation4 + $0x1], 0  ;;  %s1959_s12 = smov 0   ;;  %s1961_s13 = smov 0  }
   0x5   :  { %s1963_s14 = smov 0   ;;  %s1965_s15 = smov 0  }
   0x6   :  { %s1967_s16 = smov 0   ;;  %s1969_s17 = smov 0  }
   0x7 LB: > { %s1345_s18 = sadd.s32 4294967295, %s1932_s17   ;;  %s1346_s19 = sadd.s32 4294967294, %s1932_s17   ;;  %s1932_s17 = sphi %s1969_s17, %s20_s17   ;;  %s1928_s16 = sphi %s1967_s16, %s2222_s16   ;;  %s1924_s15 = sphi %s1965_s15, %s2221_s15   ;;  %s1920_s14 = sphi %s1963_s14, %s2220_s14   ;;  %s1916_s13 = sphi %s1961_s13, %s2219_s13   ;;  %s1912_s12 = sphi %s1959_s12, %s2218_s12  }
   0x8   : > { %p52_p0 = scmp.ne.s32.totalorder %s1916_s13, %s1912_s12  ;;  %p1993_p1 = scmp.eq.s32.totalorder %s1345_s18, 0 }
   0x9   : > { %p1997_p2 = scmp.eq.s32.totalorder %s1345_s18, 1  ;;  %p136_p3 = scmp.eq.s32.totalorder %s1346_s19, 1 }
   0xa   : > { %s2203_s20 = scalar_select %p1993_p1, 1, 0 }
   0xb   : > { %s2204_s21 = scalar_select %p1997_p2, 1, 0 }
   0xc   : > { %p2003_p4 = por %p1993_p1, %p52_p0  ;;  %p1347_p5 = scmp.ge.s32.totalorder %s1932_s17, 1 }
   0xd   : > { %p2008_p6 = por %p136_p3, %p52_p0  ;;  %p143_p7 = scmp.lt.s32.totalorder %s1932_s17, 3 }
   0xe   : > { %s2205_s22 = scalar_select %p2003_p4, 1, 0 }
   0xf   : > { %s2206_s23 = scalar_select %p2008_p6, 1, 0 }
  0x10   : > { %p2013_p8 = pnand %p1347_p5, %p143_p7  ;;  %s1934_s25 = smov [#allocation5]  }
  0x11   : > { %s158_s26 = sshll.u32 %s1934_s25, 4  ;;  %s32_s28 = sadd.s32 1, %s1928_s16  ;;  %s159_s26 = int_to_ptr.vmem [resolvable:$true] %s158_s26 }
  0x12   : > { %s2207_s24 = scalar_select %p2013_p8, 1, 0 }
  0x13   : > { %p1521_p9 = pneg %p2013_p8  ;;  %s1788_s4 = scalar_lea.hbm %s2196_s1, 16384 }
  0x14   : > { %p1789_p12 = scmp.ne.s32.totalorder %s2196_s1, %s1788_s4  ;;  %p1795_p5 = scmp.lt.u32.totalorder %s1788_s4, %s2196_s1 }
  0x15   : > { %p2022_p11 = pnand %p1521_p9, %p1993_p1 }
  0x17   : > { %p1790_p13 = pneg %p2022_p11 }
  0x19   : > { %p1791_p0 = pnand %p1790_p13, %p1789_p12 }
  0x1b   : > { %p1792_p3 = pneg %p1791_p0 }
  0x1d   : > { %p1797_p7 = pnand %p1795_p5, %p1792_p3 }
  0x1f   : > { %1800 = shalt.err (!%p1797_p7)
}
  0x20   : > { %s1801_s9 = scalar_lea.vmem %s159_s26, 16384  ;;  %p1809_p1 = scmp.lt.s32.totalorder %s159_s26, %s159_s26 }
  0x21   : > { %p1802_p9 = scmp.ne.s32.totalorder %s159_s26, %s1801_s9  ;;  %p1810_p4 = scmp.lt.s32.totalorder %s1801_s9, %s1801_s9 }
  0x23   : > { %p1804_p10 = pnand %p1802_p9, %p1790_p13  ;;  %p1811_p8 = por %p1810_p4, %p1809_p1 }
  0x25   : > { %p1805_p6 = pneg %p1804_p10 }
  0x27   : > { %p1812_p2 = pnand %p1811_p8, %p1805_p6 }
  0x29   : > { %1815 = shalt.err (!%p1812_p2)
}
  0x2a   : > { %s1935_s10 = smov 128   ;;  %s1936_s11 = smov 8  }
  0x2b   : > { %1524 = dma.hbm_to_vmem [thread:$0]  (!%p2022_p11), %s2196_s1, 16384, %s159_s26, [#allocation6], %s1935_s10, %s1935_s10, %s1936_s11  }
  0x2c   : > { %p34_p1 = scmp.ge.s32.totalorder %s32_s28, 2  ;;  %s39_s25 = sadd.s32 1, %s1920_s14 }
  0x2d   : > { %p46_p2 = scmp.ne.s32.totalorder %s1920_s14, %s1916_s13  ;;  %p47_p4 = scmp.eq.s32.totalorder %s1932_s17, 0 }
  0x2e   : > { %s2224_s28 = smov (%p34_p1, %s32_s28), 0  ;;  %p2210_p8 = scmp.ne.s32.totalorder %s2204_s21, 0 }
  0x2f   : > { %p2049_p6 = por %p47_p4, %p46_p2  ;;  %s36_s27 = ssub.s32 %s1928_s16, %s2224_s28 }
  0x30   : > { %p2055_p10 = por %p2210_p8, %p46_p2  ;;  %p1534_p12 = scmp.lt.s32.totalorder %s1932_s17, 2 }
  0x31   : > { %p37_p11 = scmp.eq.s32.totalorder %s36_s27, 0  ;;  %s180_s26 = sand.u32 1, %s1920_s14  }
  0x32   : > { %s1351_s4 = sshll.u32 %s180_s26, 5  ;;  %s1499_s6 = sshll.u32 %s1928_s16, 9 }
  0x33   : > { %s2064_s5 = scalar_select %p37_p11, %s1920_s14, %s39_s25  }
  0x34   : > { %s2070_s9 = scalar_lea.hbm %s2195_s0, %s1499_s6  ;;  %s184_s21 = scalar_lea.vmem [#allocation2], %s1351_s4 }
  0x35   : > { %s192_s10 = sshll.u32 %s184_s21, 4  ;;  %p2076_p13 = pnand %p1534_p12, %p2049_p6  ;;  %s2072_s10 = int_to_ptr.vmem [resolvable:$true] %s192_s10 }
  0x36   : > { %s181_s18 = scalar_lea.sflag [#allocation3], %s180_s26  ;;  %s1816_s19 = scalar_lea.hbm %s2070_s9, 512 }
  0x37   : > { %p1817_p0 = scmp.ne.s32.totalorder %s2070_s9, %s1816_s19  ;;  %p1818_p3 = pneg %p2076_p13 }
  0x38   : > { %s1821_s4 = scalar_lea.hbm %s2195_s0, 1024  ;;  %p1822_p9 = scmp.lt.u32.totalorder %s2070_s9, %s2195_s0 }
  0x39   : > { %p1819_p5 = pnand %p1818_p3, %p1817_p0  ;;  %p1823_p1 = scmp.lt.u32.totalorder %s1821_s4, %s1816_s19 }
  0x3a   : > { %p1825_p4 = scmp.lt.u32.totalorder %s1816_s19, %s2070_s9 }
  0x3b   : > { %p1820_p7 = pneg %p1819_p5  ;;  %p1824_p2 = por %p1823_p1, %p1822_p9 }
  0x3d   : > { %p1826_p6 = por %p1825_p4, %p1824_p2 }
  0x3f   : > { %p1827_p8 = pnand %p1826_p6, %p1820_p7 }
  0x41   : > { %1830 = shalt.err (!%p1827_p8)
}
  0x42   : > { %s1831_s26 = scalar_lea.vmem %s2072_s10, 512  ;;  %s1937_s7 = smov [#allocation2]  }
  0x43   : > { %p1832_p12 = scmp.ne.s32.totalorder %s2072_s10, %s1831_s26  ;;  %s1836_s8 = sshll.u32 %s1937_s7, 4  ;;  %s1837_s8 = int_to_ptr.vmem [resolvable:$false] %s1836_s8 }
  0x44   : > { %s1838_s21 = scalar_lea.vmem %s1837_s8, 1024  ;;  %p1839_p5 = scmp.lt.s32.totalorder %s2072_s10, %s1837_s8 }
  0x45   : > { %p1834_p11 = pnand %p1832_p12, %p1818_p3  ;;  %p1840_p9 = scmp.lt.s32.totalorder %s1838_s21, %s1831_s26 }
  0x47   : > { %p1835_p0 = pneg %p1834_p11  ;;  %p1841_p1 = por %p1840_p9, %p1839_p5 }
  0x49   : > { %p1842_p2 = pnand %p1841_p1, %p1835_p0 }
  0x4b   : > { %1845 = shalt.err (!%p1842_p2)
}
  0x4c   : > { %1528 = dma.hbm_to_vmem [thread:$0]  (!%p2076_p13), %s2070_s9, 512, %s2072_s10, %s181_s18  }
  0x4d   : > { %p2213_p7 = scmp.ne.s32.totalorder %s2207_s24, 0 }
  0x4e   : > { %s2108_s19 = sand.u32 (!%p2213_p7), 1, %s1916_s13   ;;  %p2214_p3 = scmp.ne.s32.totalorder (!%p2213_p7), %s2205_s22, 0 }
  0x4f   : > { %201 = sbr.rel (%p2213_p7) target bundleno = 450 (0x1c2), region = 32  ;;  %s1355_s25 = sshll.u32 (!%p2213_p7), %s2108_s19, 5 }
  0x50   : > { %s204_s27 = scalar_lea.sflag (!%p2213_p7), [#allocation3], %s2108_s19  ;;  %s2112_s4 = scalar_lea.vmem (!%p2213_p7), [#allocation2], %s1355_s25 }
  0x56   : > { %1899 = dma.done.wait (%p2214_p3), %s204_s27, 512  }
  0x57   : > { %1901 = vsyncadd (%p2214_p3), %s204_s27, 4294966784  ;;  %p2215_p13 = scmp.ne.s32.totalorder %s2203_s20, 0 }
  0x59   : > { %1903 = dma.done.wait (%p2215_p13), [#allocation6], 16384  }
  0x5a   : > { %1905 = vsyncadd (%p2215_p13), [#allocation6], 4294950912  ;;  %v1588_v0 = vld [vmem:[#allocation5 + $0x4] ss:$8 sps:$4 sm:$0xff]   ;;  %v1592_v2 = vld [vmem:[#allocation5] ss:$8 sps:$4 sm:$0xff]  }
  0x5b   : > { %v1590_v1 = vld [vmem:[#allocation5 + $0x204] ss:$8 sps:$4 sm:$0xff]   ;;  %1057 = vmatprep.subr.bf16.mxu1 %v1588_v0  ;;  %v1593_v3 = vld [vmem:[#allocation5 + $0x200] ss:$8 sps:$4 sm:$0xff]   ;;  %v1594_v4 = vld [vmem:[#allocation5 + $0x14] ss:$8 sps:$4 sm:$0xff]  }
  0x5c   : > { %1139 = vmatprep.subr.bf16.mxu0 %v1590_v1  ;;  %1058 = vmatpush1.bf16.msra.mxu1 %v1592_v2  ;;  %v1596_v5 = vld [vmem:[#allocation5 + $0x214] ss:$8 sps:$4 sm:$0xff]   ;;  %v1598_v6 = vld [vmem:[#allocation5 + $0x10] ss:$8 sps:$4 sm:$0xff]   ;;  %v1600_v8 = vld [vmem:[#allocation5 + $0x24] ss:$8 sps:$4 sm:$0xff]  }
  0x5d   : > { %1140 = vmatpush1.bf16.msra.mxu0 %v1593_v3  ;;  %1059 = vmatprep.subr.bf16.mxu1 %v1594_v4  ;;  %v1599_v7 = vld [vmem:[#allocation5 + $0x210] ss:$8 sps:$4 sm:$0xff]   ;;  %v1602_v9 = vld [vmem:[#allocation5 + $0x224] ss:$8 sps:$4 sm:$0xff]   ;;  %v1604_v10 = vld [vmem:[#allocation5 + $0x20] ss:$8 sps:$4 sm:$0xff]  }
  0x5e   : > { %1141 = vmatprep.subr.bf16.mxu0 %v1596_v5  ;;  %v1605_v11 = vld [vmem:[#allocation5 + $0x220] ss:$8 sps:$4 sm:$0xff]   ;;  %v1606_v12 = vld [vmem:[#allocation5 + $0x34] ss:$8 sps:$4 sm:$0xff]   ;;  %v1610_v14 = vld [vmem:[#allocation5 + $0x30] ss:$8 sps:$4 sm:$0xff]  }
  0x5f   : > { %v1608_v13 = vld [vmem:[#allocation5 + $0x234] ss:$8 sps:$4 sm:$0xff]   ;;  %v1611_v15 = vld [vmem:[#allocation5 + $0x230] ss:$8 sps:$4 sm:$0xff]   ;;  %v1612_v16 = vld [vmem:[#allocation5 + $0x44] ss:$8 sps:$4 sm:$0xff]  }
  0x60   : > { %1060 = vmatpush1.bf16.msra.mxu1 %v1598_v6  ;;  %v1614_v17 = vld [vmem:[#allocation5 + $0x244] ss:$8 sps:$4 sm:$0xff]   ;;  %v1616_v18 = vld [vmem:[#allocation5 + $0x40] ss:$8 sps:$4 sm:$0xff]   ;;  %v1618_v20 = vld [vmem:[#allocation5 + $0x54] ss:$8 sps:$4 sm:$0xff]  }
  0x61   : > { %1142 = vmatpush1.bf16.msra.mxu0 %v1599_v7  ;;  %1061 = vmatprep.subr.bf16.mxu1 %v1600_v8  ;;  %v1617_v19 = vld [vmem:[#allocation5 + $0x240] ss:$8 sps:$4 sm:$0xff]   ;;  %v1620_v21 = vld [vmem:[#allocation5 + $0x254] ss:$8 sps:$4 sm:$0xff]   ;;  %v1622_v22 = vld [vmem:[#allocation5 + $0x50] ss:$8 sps:$4 sm:$0xff]  }
  0x62   : > { %1143 = vmatprep.subr.bf16.mxu0 %v1602_v9  ;;  %v1623_v23 = vld [vmem:[#allocation5 + $0x250] ss:$8 sps:$4 sm:$0xff]   ;;  %v1624_v24 = vld [vmem:[#allocation5 + $0x64] ss:$8 sps:$4 sm:$0xff]   ;;  %v1628_v26 = vld [vmem:[#allocation5 + $0x60] ss:$8 sps:$4 sm:$0xff]  }
  0x63   : > { %v1626_v25 = vld [vmem:[#allocation5 + $0x264] ss:$8 sps:$4 sm:$0xff]   ;;  %v1629_v27 = vld [vmem:[#allocation5 + $0x260] ss:$8 sps:$4 sm:$0xff]   ;;  %v1630_v28 = vld [vmem:[#allocation5 + $0x74] ss:$8 sps:$4 sm:$0xff]  }
  0x64   : > { %1062 = vmatpush1.bf16.msra.mxu1 %v1604_v10  ;;  %v1632_v29 = vld [vmem:[#allocation5 + $0x274] ss:$8 sps:$4 sm:$0xff]   ;;  %v1634_v30 = vld [vmem:[#allocation5 + $0x70] ss:$8 sps:$4 sm:$0xff]   ;;  %v1636_v32 = vld [vmem:[#allocation5 + $0x84] ss:$8 sps:$4 sm:$0xff]  }
  0x65   : > { %1144 = vmatpush1.bf16.msra.mxu0 %v1605_v11  ;;  %1063 = vmatprep.subr.bf16.mxu1 %v1606_v12  ;;  %v1635_v31 = vld [vmem:[#allocation5 + $0x270] ss:$8 sps:$4 sm:$0xff]   ;;  %v1638_v33 = vld [vmem:[#allocation5 + $0x284] ss:$8 sps:$4 sm:$0xff]   ;;  %v1640_v34 = vld [vmem:[#allocation5 + $0x80] ss:$8 sps:$4 sm:$0xff]  }
  0x66   : > { %1145 = vmatprep.subr.bf16.mxu0 %v1608_v13  ;;  %v1641_v35 = vld [vmem:[#allocation5 + $0x280] ss:$8 sps:$4 sm:$0xff]   ;;  %v1642_v36 = vld [vmem:[#allocation5 + $0x94] ss:$8 sps:$4 sm:$0xff]   ;;  %v1646_v38 = vld [vmem:[#allocation5 + $0x90] ss:$8 sps:$4 sm:$0xff]  }
  0x67   : > { %v1644_v37 = vld [vmem:[#allocation5 + $0x294] ss:$8 sps:$4 sm:$0xff]   ;;  %v1647_v39 = vld [vmem:[#allocation5 + $0x290] ss:$8 sps:$4 sm:$0xff]   ;;  %v1648_v40 = vld [vmem:[#allocation5 + $0xa4] ss:$8 sps:$4 sm:$0xff]  }
  0x68   : > { %1064 = vmatpush1.bf16.msra.mxu1 %v1610_v14  ;;  %v1650_v41 = vld [vmem:[#allocation5 + $0x2a4] ss:$8 sps:$4 sm:$0xff]   ;;  %v1652_v42 = vld [vmem:[#allocation5 + $0xa0] ss:$8 sps:$4 sm:$0xff]   ;;  %v1654_v44 = vld [vmem:[#allocation5 + $0xb4] ss:$8 sps:$4 sm:$0xff]  }
  0x69   : > { %1146 = vmatpush1.bf16.msra.mxu0 %v1611_v15  ;;  %1065 = vmatprep.subr.bf16.mxu1 %v1612_v16  ;;  %v1653_v43 = vld [vmem:[#allocation5 + $0x2a0] ss:$8 sps:$4 sm:$0xff]   ;;  %v1656_v45 = vld [vmem:[#allocation5 + $0x2b4] ss:$8 sps:$4 sm:$0xff]   ;;  %v1658_v47 = vld [vmem:[#allocation5 + $0xb0] ss:$8 sps:$4 sm:$0xff]  }
  0x6a   : > { %1147 = vmatprep.subr.bf16.mxu0 %v1614_v17  ;;  %v245_v46 = vld [vmem:[%s2112_s4] sm:$0xff]  ;;  %v1659_v49 = vld [vmem:[#allocation5 + $0x2b0] ss:$8 sps:$4 sm:$0xff]   ;;  %v1666_v56 = vld [vmem:[#allocation5 + $0xd4] ss:$8 sps:$4 sm:$0xff]   ;;  %s1357_s24 = sshll.u32 %s2108_s19, 4 }
  0x6b   : > { %v1359_v48 = vcombine.high %v245_v46, %v245_v46  ;;  %v247_v50 = vld [vmem:[%s2112_s4 + $0x10] sm:$0xff]  ;;  %v1660_v51 = vld [vmem:[#allocation5 + $0xc4] ss:$8 sps:$4 sm:$0xff]   ;;  %v1664_v54 = vld [vmem:[#allocation5 + $0xc0] ss:$8 sps:$4 sm:$0xff]   ;;  %v1358_v6 = vcombine.low %v245_v46, %v245_v46  ;;  %s1500_s9 = sshll.u32 %s1924_s15, 8 }
  0x6c   : > { %1066 = vmatpush1.bf16.msra.mxu1 %v1616_v18  ;;  %v1662_v52 = vld [vmem:[#allocation5 + $0x2c4] ss:$8 sps:$4 sm:$0xff]   ;;  %v1363_v53 = vcombine.high %v247_v50, %v247_v50  ;;  %v1665_v55 = vld [vmem:[#allocation5 + $0x2c0] ss:$8 sps:$4 sm:$0xff]   ;;  %v1668_v57 = vld [vmem:[#allocation5 + $0x2d4] ss:$8 sps:$4 sm:$0xff]   ;;  %v1362_v7 = vcombine.low %v247_v50, %v247_v50  ;;  %s2146_s6 = scalar_lea.hbm %s2198_s3, %s1500_s9 }
  0x6d   : > { %1148 = vmatpush1.bf16.msra.mxu0 %v1617_v19  ;;  %1067 = vmatprep.subr.bf16.mxu1 %v1618_v20  ;;  %v1670_v58 = vld [vmem:[#allocation5 + $0xd0] ss:$8 sps:$4 sm:$0xff]   ;;  %v1672_v60 = vld [vmem:[#allocation5 + $0xe4] ss:$8 sps:$4 sm:$0xff]   ;;  %v1676_v62 = vld [vmem:[#allocation5 + $0xe0] ss:$8 sps:$4 sm:$0xff]  }
  0x6e   : > { %1149 = vmatprep.subr.bf16.mxu0 %v1620_v21  ;;  %1089 = vmatprep.mubr.bf16.mxu1 %v1359_v48  ;;  %v1671_v59 = vld [vmem:[#allocation5 + $0x2d0] ss:$8 sps:$4 sm:$0xff]   ;;  %v1674_v61 = vld [vmem:[#allocation5 + $0x2e4] ss:$8 sps:$4 sm:$0xff]   ;;  %v1677_v63 = vld [vmem:[#allocation5 + $0x2e0] ss:$8 sps:$4 sm:$0xff]  }
  0x6f   : > { %1171 = vmatprep.mubr.bf16.mxu0 %v1363_v53  ;;  %v1678_v0 = vld [vmem:[#allocation5 + $0xf4] ss:$8 sps:$4 sm:$0xff]   ;;  %v1682_v2 = vld [vmem:[#allocation5 + $0xf0] ss:$8 sps:$4 sm:$0xff]   ;;  %v1688_v4 = vld [vmem:[#allocation5 + $0x104] ss:$8 sps:$4 sm:$0xff]  }
  0x70   : > { %1068 = vmatpush1.bf16.msra.mxu1 %v1622_v22  ;;  %v1680_v1 = vld [vmem:[#allocation5 + $0x2f4] ss:$8 sps:$4 sm:$0xff]   ;;  %v1683_v3 = vld [vmem:[#allocation5 + $0x2f0] ss:$8 sps:$4 sm:$0xff]   ;;  %v1693_v5 = vld [vmem:[#allocation5 + $0x304] ss:$8 sps:$4 sm:$0xff]  }
  0x71   : > { %1150 = vmatpush1.bf16.msra.mxu0 %v1623_v23  ;;  %1069 = vmatprep.subr.bf16.mxu1 %v1624_v24  ;;  %v1686_v8 = vld [vmem:[#allocation5 + $0x100] ss:$8 sps:$4 sm:$0xff]   ;;  %v1696_v10 = vld [vmem:[#allocation5 + $0x114] ss:$8 sps:$4 sm:$0xff]   ;;  %v1694_v12 = vld [vmem:[#allocation5 + $0x110] ss:$8 sps:$4 sm:$0xff]  }
  0x72   : > { %1151 = vmatprep.subr.bf16.mxu0 %v1626_v25  ;;  %v1691_v9 = vld [vmem:[#allocation5 + $0x300] ss:$8 sps:$4 sm:$0xff]   ;;  %v1699_v11 = vld [vmem:[#allocation5 + $0x314] ss:$8 sps:$4 sm:$0xff]   ;;  %v1697_v13 = vld [vmem:[#allocation5 + $0x310] ss:$8 sps:$4 sm:$0xff]  }
  0x73   : > { %v1702_v14 = vld [vmem:[#allocation5 + $0x124] ss:$8 sps:$4 sm:$0xff]   ;;  %v1700_v16 = vld [vmem:[#allocation5 + $0x120] ss:$8 sps:$4 sm:$0xff]   ;;  %v1708_v18 = vld [vmem:[#allocation5 + $0x134] ss:$8 sps:$4 sm:$0xff]  }
  0x74   : > { %1070 = vmatpush1.bf16.msra.mxu1 %v1628_v26  ;;  %v1705_v15 = vld [vmem:[#allocation5 + $0x324] ss:$8 sps:$4 sm:$0xff]   ;;  %v1703_v17 = vld [vmem:[#allocation5 + $0x320] ss:$8 sps:$4 sm:$0xff]   ;;  %v1711_v19 = vld [vmem:[#allocation5 + $0x334] ss:$8 sps:$4 sm:$0xff]  }
  0x75   : > { %1152 = vmatpush1.bf16.msra.mxu0 %v1629_v27  ;;  %1071 = vmatprep.subr.bf16.mxu1 %v1630_v28  ;;  %v1706_v20 = vld [vmem:[#allocation5 + $0x130] ss:$8 sps:$4 sm:$0xff]   ;;  %v1714_v22 = vld [vmem:[#allocation5 + $0x144] ss:$8 sps:$4 sm:$0xff]   ;;  %v1712_v24 = vld [vmem:[#allocation5 + $0x140] ss:$8 sps:$4 sm:$0xff]  }
  0x76   : > { %1153 = vmatprep.subr.bf16.mxu0 %v1632_v29  ;;  %v1709_v21 = vld [vmem:[#allocation5 + $0x330] ss:$8 sps:$4 sm:$0xff]   ;;  %v1717_v23 = vld [vmem:[#allocation5 + $0x344] ss:$8 sps:$4 sm:$0xff]   ;;  %v1715_v25 = vld [vmem:[#allocation5 + $0x340] ss:$8 sps:$4 sm:$0xff]  }
  0x77   : > { %v1720_v26 = vld [vmem:[#allocation5 + $0x154] ss:$8 sps:$4 sm:$0xff]   ;;  %v1718_v28 = vld [vmem:[#allocation5 + $0x150] ss:$8 sps:$4 sm:$0xff]   ;;  %v1750_v50 = vld [vmem:[#allocation5 + $0x1a4] ss:$8 sps:$4 sm:$0xff]  }
  0x78   : > { %1072 = vmatpush1.bf16.msra.mxu1 %v1634_v30  ;;  %v1723_v27 = vld [vmem:[#allocation5 + $0x354] ss:$8 sps:$4 sm:$0xff]   ;;  %v1721_v29 = vld [vmem:[#allocation5 + $0x350] ss:$8 sps:$4 sm:$0xff]   ;;  %v1726_v30 = vld [vmem:[#allocation5 + $0x164] ss:$8 sps:$4 sm:$0xff]  }
  0x79   : > { %1154 = vmatpush1.bf16.msra.mxu0 %v1635_v31  ;;  %1073 = vmatprep.subr.bf16.mxu1 %v1636_v32  ;;  %v1729_v31 = vld [vmem:[#allocation5 + $0x364] ss:$8 sps:$4 sm:$0xff]   ;;  %v1744_v46 = vld [vmem:[#allocation5 + $0x194] ss:$8 sps:$4 sm:$0xff]   ;;  %v1742_v48 = vld [vmem:[#allocation5 + $0x190] ss:$8 sps:$4 sm:$0xff]  }
  0x7a   : > { %1155 = vmatprep.subr.bf16.mxu0 %v1638_v33  ;;  %v2125_v32 = vld [vmem:[%s2112_s4 + $0x8] sm:$0xff]  ;;  %v2128_v33 = vld [vmem:[%s2112_s4 + $0x18] sm:$0xff]  ;;  %s237_s10 = scalar_lea.vmem [#allocation7], %s1357_s24  ;;  %s1224_s15 = scalar_lea.sflag [#allocation4], %s2108_s19 }
  0x7b   : > { %v1751_v53 = vld [vmem:[#allocation5 + $0x3a0] ss:$8 sps:$4 sm:$0xff]   ;;  %s1240_s11 = sshll.u32 %s237_s10, 4  ;;  %s1938_s7 = smov [#allocation7]   ;;  %s2148_s11 = int_to_ptr.vmem [resolvable:$true] %s1240_s11 }
  0x7c   : > { %1074 = vmatpush1.bf16.msra.mxu1 %v1640_v34  ;;  %v1361_v34 = vcombine.high %v2125_v32, %v2125_v32  ;;  %s1846_s26 = scalar_lea.vmem %s2148_s11, 256  ;;  %s1850_s8 = sshll.u32 %s1938_s7, 4  ;;  %s1851_s8 = int_to_ptr.vmem [resolvable:$false] %s1850_s8 }
  0x7d   : > { %1156 = vmatpush1.bf16.msra.mxu0 %v1641_v35  ;;  %1075 = vmatprep.subr.bf16.mxu1 %v1642_v36  ;;  %v1365_v35 = vcombine.high %v2128_v33, %v2128_v33  ;;  %v1724_v36 = vld [vmem:[#allocation5 + $0x160] ss:$8 sps:$4 sm:$0xff]   ;;  %p1847_p4 = scmp.ne.s32.totalorder %s2148_s11, %s1846_s26  ;;  %s1852_s21 = scalar_lea.vmem %s1851_s8, 512 }
  0x7e   : > { %1157 = vmatprep.subr.bf16.mxu0 %v1644_v37  ;;  %v1727_v37 = vld [vmem:[#allocation5 + $0x360] ss:$8 sps:$4 sm:$0xff]   ;;  %p1853_p12 = scmp.lt.s32.totalorder %s2148_s11, %s1851_s8  ;;  %p1854_p11 = scmp.lt.s32.totalorder %s1852_s21, %s1846_s26 }
  0x7f   : > { %p1848_p6 = pnand %p1847_p4, %p2055_p10 }
  0x80   : > { %1076 = vmatpush1.bf16.msra.mxu1 %v1646_v38  ;;  %v1732_v38 = vld [vmem:[#allocation5 + $0x174] ss:$8 sps:$4 sm:$0xff]   ;;  %p1855_p0 = por %p1854_p11, %p1853_p12 }
  0x81   : > { %1158 = vmatpush1.bf16.msra.mxu0 %v1647_v39  ;;  %1077 = vmatprep.subr.bf16.mxu1 %v1648_v40  ;;  %v1735_v39 = vld [vmem:[#allocation5 + $0x374] ss:$8 sps:$4 sm:$0xff]   ;;  %v1730_v40 = vld [vmem:[#allocation5 + $0x170] ss:$8 sps:$4 sm:$0xff]   ;;  %p1849_p8 = pneg %p1848_p6 }
  0x82   : > { %1159 = vmatprep.subr.bf16.mxu0 %v1650_v41  ;;  %v1733_v41 = vld [vmem:[#allocation5 + $0x370] ss:$8 sps:$4 sm:$0xff]  }
  0x83   : > { %p1856_p5 = pnand %p1855_p0, %p1849_p8 }
  0x84   : > { %1078 = vmatpush1.bf16.msra.mxu1 %v1652_v42  ;;  %v1738_v42 = vld [vmem:[#allocation5 + $0x184] ss:$8 sps:$4 sm:$0xff]  }
  0x85   : > { %1160 = vmatpush1.bf16.msra.mxu0 %v1653_v43  ;;  %1079 = vmatprep.subr.bf16.mxu1 %v1654_v44  ;;  %v1741_v43 = vld [vmem:[#allocation5 + $0x384] ss:$8 sps:$4 sm:$0xff]   ;;  %v1736_v44 = vld [vmem:[#allocation5 + $0x180] ss:$8 sps:$4 sm:$0xff]  }
  0x86   : > { %1161 = vmatprep.subr.bf16.mxu0 %v1656_v45  ;;  %v1739_v45 = vld [vmem:[#allocation5 + $0x380] ss:$8 sps:$4 sm:$0xff]  }
  0x88   : > { %1080 = vmatpush1.bf16.msra.mxu1 %v1658_v47  ;;  %v1747_v47 = vld [vmem:[#allocation5 + $0x394] ss:$8 sps:$4 sm:$0xff]  }
  0x89   : > { %1162 = vmatpush1.bf16.msra.mxu0 %v1659_v49  ;;  %1081 = vmatprep.subr.bf16.mxu1 %v1660_v51  ;;  %v1745_v49 = vld [vmem:[#allocation5 + $0x390] ss:$8 sps:$4 sm:$0xff]   ;;  %v1753_v51 = vld [vmem:[#allocation5 + $0x3a4] ss:$8 sps:$4 sm:$0xff]  }
  0x8a   : > { %1163 = vmatprep.subr.bf16.mxu0 %v1662_v52  ;;  %v1748_v52 = vld [vmem:[#allocation5 + $0x1a0] ss:$8 sps:$4 sm:$0xff]  }
  0x8c   : > { %1082 = vmatpush1.bf16.msra.mxu1 %v1664_v54  ;;  %v1756_v54 = vld [vmem:[#allocation5 + $0x1b4] ss:$8 sps:$4 sm:$0xff]  }
  0x8d   : > { %1164 = vmatpush1.bf16.msra.mxu0 %v1665_v55  ;;  %1083 = vmatprep.subr.bf16.mxu1 %v1666_v56  ;;  %v1759_v55 = vld [vmem:[#allocation5 + $0x3b4] ss:$8 sps:$4 sm:$0xff]   ;;  %v1754_v56 = vld [vmem:[#allocation5 + $0x1b0] ss:$8 sps:$4 sm:$0xff]  }
  0x8e   : > { %1165 = vmatprep.subr.bf16.mxu0 %v1668_v57  ;;  %v1757_v57 = vld [vmem:[#allocation5 + $0x3b0] ss:$8 sps:$4 sm:$0xff]  }
  0x90   : > { %1084 = vmatpush1.bf16.msra.mxu1 %v1670_v58  ;;  %v1762_v58 = vld [vmem:[#allocation5 + $0x1c4] ss:$8 sps:$4 sm:$0xff]  }
  0x91   : > { %1166 = vmatpush1.bf16.msra.mxu0 %v1671_v59  ;;  %1085 = vmatprep.subr.bf16.mxu1 %v1672_v60  ;;  %v1765_v59 = vld [vmem:[#allocation5 + $0x3c4] ss:$8 sps:$4 sm:$0xff]   ;;  %v1760_v60 = vld [vmem:[#allocation5 + $0x1c0] ss:$8 sps:$4 sm:$0xff]  }
  0x92   : > { %1167 = vmatprep.subr.bf16.mxu0 %v1674_v61  ;;  %v1763_v61 = vld [vmem:[#allocation5 + $0x3c0] ss:$8 sps:$4 sm:$0xff]  }
  0x94   : > { %1086 = vmatpush1.bf16.msra.mxu1 %v1676_v62  ;;  %v1768_v62 = vld [vmem:[#allocation5 + $0x1d4] ss:$8 sps:$4 sm:$0xff]  }
  0x95   : > { %1168 = vmatpush1.bf16.msra.mxu0 %v1677_v63  ;;  %1087 = vmatprep.subr.bf16.mxu1 %v1678_v0  ;;  %v1771_v63 = vld [vmem:[#allocation5 + $0x3d4] ss:$8 sps:$4 sm:$0xff]   ;;  %v1766_v0 = vld [vmem:[#allocation5 + $0x1d0] ss:$8 sps:$4 sm:$0xff]  }
  0x96   : > { %1169 = vmatprep.subr.bf16.mxu0 %v1680_v1  ;;  %v1769_v1 = vld [vmem:[#allocation5 + $0x3d0] ss:$8 sps:$4 sm:$0xff]  }
  0x98   : > { %1088 = vmatpush1.bf16.msra.mxu1 %v1682_v2  ;;  %v1774_v2 = vld [vmem:[#allocation5 + $0x1e4] ss:$8 sps:$4 sm:$0xff]  }
  0x99   : > { %1170 = vmatpush1.bf16.msra.mxu0 %v1683_v3  ;;  %1098 = vmatprep.subr.bf16.mxu1 %v1688_v4  ;;  %v1777_v3 = vld [vmem:[#allocation5 + $0x3e4] ss:$8 sps:$4 sm:$0xff]   ;;  %v1772_v4 = vld [vmem:[#allocation5 + $0x1e0] ss:$8 sps:$4 sm:$0xff]  }
  0x9a   : > { %1180 = vmatprep.subr.bf16.mxu0 %v1693_v5  ;;  %v1775_v5 = vld [vmem:[#allocation5 + $0x3e0] ss:$8 sps:$4 sm:$0xff]  }
  0x9b   : > { %1090 = vmatmul.mubr.bf16.vlgmr.msra.gmra.mrb[0].mxu1 %v1358_v6  ;;  %v1780_v6 = vld [vmem:[#allocation5 + $0x1f4] ss:$8 sps:$4 sm:$0xff]  }
  0x9c   : > { %1172 = vmatmul.mubr.bf16.vlgmr.msra.gmra.mrb[0].mxu0 %v1362_v7  ;;  %1099 = vmatpush1.bf16.msra.mxu1 %v1686_v8  ;;  %v1783_v7 = vld [vmem:[#allocation5 + $0x3f4] ss:$8 sps:$4 sm:$0xff]   ;;  %v1778_v8 = vld [vmem:[#allocation5 + $0x1f0] ss:$8 sps:$4 sm:$0xff]  }
  0x9d   : > { %1181 = vmatpush1.bf16.msra.mxu0 %v1691_v9  ;;  %1100 = vmatprep.subr.bf16.mxu1 %v1696_v10  ;;  %v1781_v9 = vld [vmem:[#allocation5 + $0x3f0] ss:$8 sps:$4 sm:$0xff]   ;;  %v1360_v10 = vcombine.low %v2125_v32, %v2125_v32 }
  0x9e   : > { %1182 = vmatprep.subr.bf16.mxu0 %v1699_v11  ;;  %1130 = vmatprep.mubr.bf16.mxu1 %v1361_v34  ;;  %v1364_v11 = vcombine.low %v2128_v33, %v2128_v33 }
  0x9f   : > { %1212 = vmatprep.mubr.bf16.mxu0 %v1365_v35 }
  0xa0   : > { %1101 = vmatpush1.bf16.msra.mxu1 %v1694_v12  ;;  %v379_v12 = vlaneseq }
  0xa1   : > { %1183 = vmatpush1.bf16.msra.mxu0 %v1697_v13  ;;  %1102 = vmatprep.subr.bf16.mxu1 %v1702_v14 }
  0xa2   : > { %1184 = vmatprep.subr.bf16.mxu0 %v1705_v15  ;;  %v380_v13 = vshrl.u32 %v379_v12, 7  ;;  %v377_v15 = vld [vmem:[%s2197_s2] sm:$0x3] }
  0xa4   : > { %1103 = vmatpush1.bf16.msra.mxu1 %v1700_v16  ;;  %v381_v14 = vsub.s32 0, %v380_v13  ;;  %v385_v16 = vsub.s32 1, %v380_v13 }
  0xa5   : > { %1185 = vmatpush1.bf16.msra.mxu0 %v1703_v17  ;;  %1104 = vmatprep.subr.bf16.mxu1 %v1708_v18 }
  0xa6   : > { %1186 = vmatprep.subr.bf16.mxu0 %v1711_v19  ;;  %v382_v17 = vrot.slane %v377_v15, %v381_v14  ;;  %v386_v18 = vrot.slane %v377_v15, %v385_v16 }
  0xa8   : > { %1105 = vmatpush1.bf16.msra.mxu1 %v1706_v20 }
  0xa9   : > { %1187 = vmatpush1.bf16.msra.mxu0 %v1709_v21  ;;  %1106 = vmatprep.subr.bf16.mxu1 %v1714_v22 }
  0xaa   : > { %1188 = vmatprep.subr.bf16.mxu0 %v1717_v23 }
  0xac   : > { %1107 = vmatpush1.bf16.msra.mxu1 %v1712_v24 }
  0xad   : > { %1189 = vmatpush1.bf16.msra.mxu0 %v1715_v25  ;;  %1108 = vmatprep.subr.bf16.mxu1 %v1720_v26 }
  0xae   : > { %1190 = vmatprep.subr.bf16.mxu0 %v1723_v27 }
  0xb0   : > { %1109 = vmatpush1.bf16.msra.mxu1 %v1718_v28 }
  0xb1   : > { %1191 = vmatpush1.bf16.msra.mxu0 %v1721_v29  ;;  %1110 = vmatprep.subr.bf16.mxu1 %v1726_v30 }
  0xb2   : > { %1192 = vmatprep.subr.bf16.mxu0 %v1729_v31 }
  0xb4   : > { %1111 = vmatpush1.bf16.msra.mxu1 %v1724_v36 }
  0xb5   : > { %1193 = vmatpush1.bf16.msra.mxu0 %v1727_v37  ;;  %1112 = vmatprep.subr.bf16.mxu1 %v1732_v38 }
  0xb6   : > { %1194 = vmatprep.subr.bf16.mxu0 %v1735_v39 }
  0xb8   : > { %1113 = vmatpush1.bf16.msra.mxu1 %v1730_v40 }
  0xb9   : > { %1195 = vmatpush1.bf16.msra.mxu0 %v1733_v41  ;;  %1114 = vmatprep.subr.bf16.mxu1 %v1738_v42 }
  0xba   : > { %1196 = vmatprep.subr.bf16.mxu0 %v1741_v43 }
  0xbc   : > { %1115 = vmatpush1.bf16.msra.mxu1 %v1736_v44 }
  0xbd   : > { %1197 = vmatpush1.bf16.msra.mxu0 %v1739_v45  ;;  %1116 = vmatprep.subr.bf16.mxu1 %v1744_v46 }
  0xbe   : > { %1198 = vmatprep.subr.bf16.mxu0 %v1747_v47 }
  0xc0   : > { %1117 = vmatpush1.bf16.msra.mxu1 %v1742_v48 }
  0xc1   : > { %1199 = vmatpush1.bf16.msra.mxu0 %v1745_v49  ;;  %1118 = vmatprep.subr.bf16.mxu1 %v1750_v50 }
  0xc2   : > { %1200 = vmatprep.subr.bf16.mxu0 %v1753_v51 }
  0xc4   : > { %1119 = vmatpush1.bf16.msra.mxu1 %v1748_v52 }
  0xc5   : > { %1201 = vmatpush1.bf16.msra.mxu0 %v1751_v53  ;;  %1120 = vmatprep.subr.bf16.mxu1 %v1756_v54 }
  0xc6   : > { %1202 = vmatprep.subr.bf16.mxu0 %v1759_v55 }
  0xc8   : > { %1121 = vmatpush1.bf16.msra.mxu1 %v1754_v56 }
  0xc9   : > { %1203 = vmatpush1.bf16.msra.mxu0 %v1757_v57  ;;  %1122 = vmatprep.subr.bf16.mxu1 %v1762_v58 }
  0xca   : > { %1204 = vmatprep.subr.bf16.mxu0 %v1765_v59 }
  0xcc   : > { %1123 = vmatpush1.bf16.msra.mxu1 %v1760_v60 }
  0xcd   : > { %1205 = vmatpush1.bf16.msra.mxu0 %v1763_v61  ;;  %1124 = vmatprep.subr.bf16.mxu1 %v1768_v62 }
  0xce   : > { %1206 = vmatprep.subr.bf16.mxu0 %v1771_v63 }
  0xd0   : > { %1125 = vmatpush1.bf16.msra.mxu1 %v1766_v0 }
  0xd1   : > { %1207 = vmatpush1.bf16.msra.mxu0 %v1769_v1  ;;  %1126 = vmatprep.subr.bf16.mxu1 %v1774_v2 }
  0xd2   : > { %1208 = vmatprep.subr.bf16.mxu0 %v1777_v3 }
  0xd4   : > { %1127 = vmatpush1.bf16.msra.mxu1 %v1772_v4 }
  0xd5   : > { %1209 = vmatpush1.bf16.msra.mxu0 %v1775_v5  ;;  %1128 = vmatprep.subr.bf16.mxu1 %v1780_v6 }
  0xd6   : > { %1210 = vmatprep.subr.bf16.mxu0 %v1783_v7 }
  0xd8   : > { %1129 = vmatpush1.bf16.msra.mxu1 %v1778_v8 }
  0xd9   : > { %1211 = vmatpush1.bf16.msra.mxu0 %v1781_v9 }
  0xdb   : > { %1131 = vmatmul.mubr.bf16.vlgmr.msra.gmra.mrb[0].mxu1 %v1360_v10 }
  0xdc   : > { %1213 = vmatmul.mubr.bf16.vlgmr.msra.gmra.mrb[0].mxu0 %v1364_v11 }
 0x1ae   : > { %v1132_v19 = vpop.f32.mrb[0].mxu1 }
 0x1af   : > { %v1214_v20 = vpop.f32.mrb[0].mxu0  ;;  %v1501_v21 = vadd.f32 %v1132_v19, %v382_v17  ;;  %v1134_v22 = vpop.f32.mrb[1].mxu1 }
 0x1b0   : > { %v1216_v23 = vpop.f32.mrb[1].mxu0  ;;  %v1503_v24 = vadd.f32 %v1134_v22, %v386_v18  ;;  %v1136_v25 = vpop.f32.mrb[2].mxu1 }
 0x1b1   : > { %v1218_v26 = vpop.f32.mrb[2].mxu0  ;;  %v1502_v27 = vadd.f32 %v1501_v21, %v1214_v20  ;;  %v1137_v28 = vpop.f32.mrb[3].mxu1 }
 0x1b2   : > { %v1219_v29 = vpop.f32.mrb[3].mxu0  ;;  %v1504_v30 = vadd.f32 %v1503_v24, %v1216_v23 }
 0x1b3   : > { %1221 = vst [vmem:[%s237_s10] sm:$0xff] %v1502_v27 }
 0x1b4   : > { %1222 = vst [vmem:[%s237_s10 + $0x8] sm:$0xff] %v1504_v30 }
 0x1b5   : > { %1859 = shalt.err (!%p1856_p5)
}
 0x1b6   : > { %s1860_s19 = scalar_lea.hbm %s2146_s6, 256  ;;  %s1864_s4 = scalar_lea.hbm %s2198_s3, 512 }
 0x1b7   : > { %p1861_p9 = scmp.ne.s32.totalorder %s2146_s6, %s1860_s19  ;;  %p1865_p7 = scmp.lt.u32.totalorder %s2146_s6, %s2198_s3 }
 0x1b8   : > { %p1866_p3 = scmp.lt.u32.totalorder %s1864_s4, %s1860_s19  ;;  %p1868_p4 = scmp.lt.u32.totalorder %s1860_s19, %s2146_s6 }
 0x1b9   : > { %p1862_p1 = pnand %p1861_p9, %p2055_p10 }
 0x1ba   : > { %p1867_p13 = por %p1866_p3, %p1865_p7 }
 0x1bb   : > { %p1863_p2 = pneg %p1862_p1 }
 0x1bc   : > { %p1869_p6 = por %p1868_p4, %p1867_p13 }
 0x1be   : > { %p1870_p8 = pnand %p1869_p6, %p1863_p2 }
 0x1c0   : > { %1873 = shalt.err (!%p1870_p8)
}
 0x1c1   : > { %1519 = dma.vmem_to_hbm [thread:$0]  (%p2055_p10), %s2148_s11, 256, %s2146_s6, %s1224_s15  }
 0x1c2 PF: > { %s1252_s24 = sand.u32 1, %s1912_s12   ;;  %p2216_p12 = scmp.ne.s32.totalorder %s2206_s23, 0 }
 0x1c3   : > { %p2217_p11 = scmp.ge.s32.totalorder %s1932_s17, 2  ;;  %s1253_s9 = scalar_lea.sflag [#allocation4], %s1252_s24 }
 0x1c5   : > { %p1530_p0 = pnand %p2217_p11, %p2216_p12 }
 0x1c7   : > { %1907 = dma.done.wait (!%p1530_p0), %s1253_s9, 256  }
 0x1c8   : > { %1909 = vsyncadd (!%p1530_p0), %s1253_s9, 4294967040  ;;  %s20_s17 = sadd.s32 1, %s1932_s17   ;;  %s2218_s12 = smov %s1916_s13 }
 0x1c9   : > { %p17_p5 = scmp.ge.s32.totalorder %s20_s17, 4   ;;  %s2219_s13 = smov %s1920_s14 }
 0x1ca   : > { %s2220_s14 = smov %s2064_s5  ;;  %s2221_s15 = smov %s1928_s16 }
 0x1cb   : > { %s2222_s16 = smov %s2224_s28  ;;  %19 = sbr.rel (!%p17_p5) target bundleno = 7 (0x7), region = 85 }
 0x1d2   :  { %1258 = vsyncpa [#allocation3], 1 }
 0x1d3   :  { %1260 = vsyncpa [#allocation3 + $0x1], 1 }
 0x1d4   :  { %1261 = vsyncpa [#allocation6], 1 }
 0x1d5   :  { %1262 = vsyncpa [#allocation4], 1 }
 0x1d6   :  { %1264 = vsyncpa [#allocation4 + $0x1], 1 }

</bundles_post_ra>
